<compile_context>
chip_gen: v7x
topology: tpu7x:2x2x1
jax: 0.10.0
libtpu: 0.0.40
codegen_flags: <defaults>
</compile_context>

<pallas_src>
import functools
import math

import jax
import jax.numpy as jnp
from jax import lax
from jax.experimental import pallas as pl
from jax.experimental.pallas import tpu as pltpu

_NEG_INF = -1e30  # large-negative instead of -inf: avoids inf-inf NaN corners


def _round_up(x, m):
    return ((x + m - 1) // m) * m


def _flash_kernel(q_ref, k_ref, slab_ref, o_ref, m_scr, l_scr, acc_scr,
                  *, hw, scale, tk):
    """One (batch, q-tile, kv-tile) step of online-softmax attention.

    q_ref:    (TQ, C)       bf16
    k_ref:    (TK, C)       bf16
    slab_ref: (TK, CV_pad)  bf16   = [value | flow0 | flow1 | 0-pad]
    o_ref:    (TQ, CV_pad)  f32    written only on the last KV step
    """
    ki = pl.program_id(2)

    @pl.when(ki == 0)
    def _():
        m_scr[...] = jnp.full(m_scr.shape, _NEG_INF, dtype=jnp.float32)
        l_scr[...] = jnp.zeros(l_scr.shape, dtype=jnp.float32)
        acc_scr[...] = jnp.zeros(acc_scr.shape, dtype=jnp.float32)

    q = q_ref[...]                       # (TQ, C) bf16
    k = k_ref[...]                       # (TK, C) bf16
    # scores = (q @ k^T) * scale -- contract on C directly, no in-kernel .T
    scores = lax.dot_general(
        q, k, (((1,), (1,)), ((), ())),
        preferred_element_type=jnp.float32) * scale          # (TQ, TK) f32

    # Mask padded KV columns (HW rounded up to a multiple of TK).
    col = ki * tk + lax.broadcasted_iota(jnp.int32, scores.shape, 1)
    scores = jnp.where(col < hw, scores, _NEG_INF)

    m_prev = m_scr[...]
    m_new = jnp.maximum(m_prev, jnp.max(scores, axis=-1, keepdims=True))
    alpha = jnp.exp(m_prev - m_new)
    p = jnp.exp(scores - m_new)                               # (TQ, TK) f32

    l_scr[...] = alpha * l_scr[...] + jnp.sum(p, axis=-1, keepdims=True)
    acc_scr[...] = alpha * acc_scr[...] + jnp.dot(
        p.astype(jnp.bfloat16), slab_ref[...],
        preferred_element_type=jnp.float32)                   # (TQ, CV_pad)
    m_scr[...] = m_new

    @pl.when(ki == pl.num_programs(2) - 1)
    def _():
        inv_l = pl.reciprocal(l_scr[...], approx=True)
        o_ref[...] = (acc_scr[...] * inv_l).astype(o_ref.dtype)


def self_attn_propagation(feat_t, flow0, flow1, params, *, tq=256, tk=512):
    """feat_t: [B, C, H, W]; flow0/flow1: [B, CF, H, W] (NCHW, like PyTorch)."""
    b, c, h, w = feat_t.shape
    cf0, cf1 = flow0.shape[1], flow1.shape[1]
    hw = h * w

    # NCHW -> token-major [B, HW, C].
    # TODO(synk): accept NHWC inputs from the producer to skip these two extra
    # HBM passes over feat/flows (pure layout plumbing).
    feat_s = jnp.transpose(feat_t, (0, 2, 3, 1)).reshape(b, hw, c)
    f0_s = jnp.transpose(flow0, (0, 2, 3, 1)).reshape(b, hw, cf0)
    f1_s = jnp.transpose(flow1, (0, 2, 3, 1)).reshape(b, hw, cf1)

    # ---- projections as fused XLA GEMMs (hoisted out of the Pallas kernel) ----
    # Quirk of the original module preserved: k_proj / v_proj are applied to the
    # *projected* query, not to the raw features.
    wq_t = params["wq"].T                                              # (C, C)
    wkv_t = jnp.concatenate([params["wk"].T, params["wv"].T], axis=1)  # (C, 2C)
    bkv = jnp.concatenate([params["bk"], params["bv"]], axis=0)        # (2C,)

    query = feat_s @ wq_t + params["bq"]          # (B, HW, C)  f32
    kv = query @ wkv_t + bkv                      # (B, HW, 2C) f32
    key = kv[..., :c]
    value = kv[..., c:]

    # Fused, lane-dense slab: [ value | flow0 | flow1 | 0-pad ] -> CV_pad lanes.
    cv = c + cf0 + cf1
    cv_pad = _round_up(cv, 128)

    # Tile sizes & HW padding (blocks must have the second-to-last dim % 8 == 0).
    tq = min(tq, _round_up(hw, 8))
    tk = min(tk, _round_up(hw, 8))
    hw_q = _round_up(hw, tq)
    hw_k = _round_up(hw, tk)

    q_p = jnp.pad(query, ((0, 0), (0, hw_q - hw), (0, 0))).astype(jnp.bfloat16)
    k_p = jnp.pad(key, ((0, 0), (0, hw_k - hw), (0, 0))).astype(jnp.bfloat16)
    slab = jnp.concatenate([value, f0_s, f1_s], axis=-1)
    slab_p = jnp.pad(
        slab, ((0, 0), (0, hw_k - hw), (0, cv_pad - cv))).astype(jnp.bfloat16)

    scale = 1.0 / math.sqrt(float(c))
    kernel = functools.partial(_flash_kernel, hw=hw, scale=scale, tk=tk)

    out = pl.pallas_call(
        kernel,
        grid=(b, hw_q // tq, hw_k // tk),
        in_specs=[
            pl.BlockSpec((None, tq, c), lambda bi, qi, ki: (bi, qi, 0)),
            pl.BlockSpec((None, tk, c), lambda bi, qi, ki: (bi, ki, 0)),
            pl.BlockSpec((None, tk, cv_pad), lambda bi, qi, ki: (bi, ki, 0)),
        ],
        out_specs=pl.BlockSpec((None, tq, cv_pad),
                               lambda bi, qi, ki: (bi, qi, 0)),
        out_shape=jax.ShapeDtypeStruct((b, hw_q, cv_pad), jnp.float32),
        scratch_shapes=[
            pltpu.VMEM((tq, 1), jnp.float32),        # running row max  m
            pltpu.VMEM((tq, 1), jnp.float32),        # running row sum  l
            pltpu.VMEM((tq, cv_pad), jnp.float32),   # running output acc
        ],
        compiler_params=pltpu.CompilerParams(
            dimension_semantics=("parallel", "parallel", "arbitrary")),
    )(q_p, k_p, slab_p)

    # Slice the fused slab back apart and restore NCHW.
    out = out[:, :hw, :]
    refined_feat = out[..., :c]
    refined_f0 = out[..., c:c + cf0]
    refined_f1 = out[..., c + cf0:cv]

    refined_feat = jnp.transpose(refined_feat.reshape(b, h, w, c), (0, 3, 1, 2))
    refined_f0 = jnp.transpose(refined_f0.reshape(b, h, w, cf0), (0, 3, 1, 2))
    refined_f1 = jnp.transpose(refined_f1.reshape(b, h, w, cf1), (0, 3, 1, 2))
    return refined_feat, refined_f0, refined_f1


# ----------------------------- params & reference ---------------------------


def _xavier_uniform(key, fan_out, fan_in):
    bound = math.sqrt(6.0 / (fan_in + fan_out))
    return jax.random.uniform(key, (fan_out, fan_in), jnp.float32, -bound, bound)


def init_params(key, in_c):
    kq, kk, kv, kbq, kbk, kbv = jax.random.split(key, 6)
    bbound = 1.0 / math.sqrt(in_c)
    return {
        "wq": _xavier_uniform(kq, in_c, in_c),
        "wk": _xavier_uniform(kk, in_c, in_c),
        "wv": _xavier_uniform(kv, in_c, in_c),
        "bq": jax.random.uniform(kbq, (in_c,), jnp.float32, -bbound, bbound),
        "bk": jax.random.uniform(kbk, (in_c,), jnp.float32, -bbound, bbound),
        "bv": jax.random.uniform(kbv, (in_c,), jnp.float32, -bbound, bbound),
    }


def _reference(feat_t, flow0, flow1, params):
    # pure-JAX (f32) reference mirroring the PyTorch forward
    b, c, h, w = feat_t.shape
    q_in = jnp.transpose(feat_t.reshape(b, c, h * w), (0, 2, 1))
    f0 = jnp.transpose(flow0.reshape(b, flow0.shape[1], h * w), (0, 2, 1))
    f1 = jnp.transpose(flow1.reshape(b, flow1.shape[1], h * w), (0, 2, 1))
    query = q_in @ params["wq"].T + params["bq"]
    key = query @ params["wk"].T + params["bk"]
    value = query @ params["wv"].T + params["bv"]
    scores = jnp.einsum("bqc,bkc->bqk", query, key) / math.sqrt(c)
    prob = jax.nn.softmax(scores, axis=-1)
    rf = prob @ value
    r0 = prob @ f0
    r1 = prob @ f1
    rf = jnp.transpose(rf.reshape(b, h, w, c), (0, 3, 1, 2))
    r0 = jnp.transpose(r0.reshape(b, h, w, f0.shape[-1]), (0, 3, 1, 2))
    r1 = jnp.transpose(r1.reshape(b, h, w, f1.shape[-1]), (0, 3, 1, 2))
    return rf, r0, r1


if __name__ == "__main__":
    B, C, H, W = 2, 32, 8, 8
    CF = 2  # flow channels
    key = jax.random.PRNGKey(0)
    kf, k0, k1, kp = jax.random.split(key, 4)
    feat_t = jax.random.normal(kf, (B, C, H, W), jnp.float32)
    flow0 = jax.random.normal(k0, (B, CF, H, W), jnp.float32)
    flow1 = jax.random.normal(k1, (B, CF, H, W), jnp.float32)
    params = init_params(kp, C)

    fn = jax.jit(self_attn_propagation)
    outs = jax.block_until_ready(fn(feat_t, flow0, flow1, params))

    refs = _reference(feat_t, flow0, flow1, params)
    for o, r in zip(outs, refs):
        assert o.shape == r.shape, (o.shape, r.shape)
        # bf16 MXU operands + approx reciprocal -> relaxed tolerance vs f32 ref
        err = float(jnp.max(jnp.abs(o - r)))
        assert jnp.allclose(o, r, atol=5e-2, rtol=5e-2), err

    print("KERNEL_OK")
</pallas_src>

<mosaic_0001>
module attributes {stable_mosaic.version = 11 : i64} {
  func.func @_flash_kernel(%arg0: i32, %arg1: i32, %arg2: i32, %arg3: memref<1x64x32xbf16, #tpu.memory_space<vmem>>, %arg4: memref<1x64x32xbf16, #tpu.memory_space<vmem>>, %arg5: memref<1x64x128xbf16, #tpu.memory_space<vmem>>, %arg6: memref<1x64x128xf32, #tpu.memory_space<vmem>>, %arg7: memref<64x1xf32, #tpu.memory_space<vmem>>, %arg8: memref<64x1xf32, #tpu.memory_space<vmem>>, %arg9: memref<64x128xf32, #tpu.memory_space<vmem>>) attributes {dimension_semantics = [#tpu.dimension_semantics<parallel>, #tpu.dimension_semantics<parallel>, #tpu.dimension_semantics<arbitrary>], iteration_bounds = array<i64: 2, 1, 1>, scalar_prefetch = 0 : i64, scratch_operands = 3 : i64, tpu.core_type = #tpu.core_type<tc>, window_params = [{transform_indices = @transform_0, window_bounds = array<i64: 1, 64, 32>}, {transform_indices = @transform_1, window_bounds = array<i64: 1, 64, 32>}, {transform_indices = @transform_2, window_bounds = array<i64: 1, 64, 128>}, {transform_indices = @transform_3, window_bounds = array<i64: 1, 64, 128>}]} {
    %c0_i32 = arith.constant 0 : i32
    %0 = arith.cmpi eq, %arg2, %c0_i32 : i32
    %1 = arith.extui %0 : i1 to i32
    %c0_i32_0 = arith.constant 0 : i32
    %2 = arith.cmpi ne, %1, %c0_i32_0 : i32
    scf.if %2 {
      %cst_29 = arith.constant -1.000000e+30 : f32
      %46 = vector.broadcast %cst_29 : f32 to vector<64x1xf32>
      %c0_30 = arith.constant 0 : index
      %c0_31 = arith.constant 0 : index
      %47 = vector.load %arg7[%c0_30, %c0_31] : memref<64x1xf32, #tpu.memory_space<vmem>>, vector<64x1xf32>
      tpu.vector_store %arg7[%c0_30, %c0_31], %46 {strides = array<i32>} : memref<64x1xf32, #tpu.memory_space<vmem>>, vector<64x1xf32>,
      %cst_32 = arith.constant 0.000000e+00 : f32
      %48 = vector.broadcast %cst_32 : f32 to vector<64x1xf32>
      %c0_33 = arith.constant 0 : index
      %c0_34 = arith.constant 0 : index
      %49 = vector.load %arg8[%c0_33, %c0_34] : memref<64x1xf32, #tpu.memory_space<vmem>>, vector<64x1xf32>
      tpu.vector_store %arg8[%c0_33, %c0_34], %48 {strides = array<i32>} : memref<64x1xf32, #tpu.memory_space<vmem>>, vector<64x1xf32>,
      %cst_35 = arith.constant 0.000000e+00 : f32
      %50 = vector.broadcast %cst_35 : f32 to vector<64x128xf32>
      %c0_36 = arith.constant 0 : index
      %c0_37 = arith.constant 0 : index
      %51 = vector.load %arg9[%c0_36, %c0_37] : memref<64x128xf32, #tpu.memory_space<vmem>>, vector<64x128xf32>
      tpu.vector_store %arg9[%c0_36, %c0_37], %50 {strides = array<i32>} : memref<64x128xf32, #tpu.memory_space<vmem>>, vector<64x128xf32>,
    } else {
    }
    %c0 = arith.constant 0 : index
    %c0_1 = arith.constant 0 : index
    %c0_2 = arith.constant 0 : index
    %3 = vector.load %arg3[%c0, %c0_1, %c0_2] : memref<1x64x32xbf16, #tpu.memory_space<vmem>>, vector<1x64x32xbf16>
    %4 = vector.shape_cast %3 : vector<1x64x32xbf16> to vector<64x32xbf16>
    %c0_3 = arith.constant 0 : index
    %c0_4 = arith.constant 0 : index
    %c0_5 = arith.constant 0 : index
    %5 = vector.load %arg4[%c0_3, %c0_4, %c0_5] : memref<1x64x32xbf16, #tpu.memory_space<vmem>>, vector<1x64x32xbf16>
    %6 = vector.shape_cast %5 : vector<1x64x32xbf16> to vector<64x32xbf16>
    %cst = arith.constant dense<0.000000e+00> : vector<64x64xf32>
    %7 = tpu.matmul %4, %6, %cst {dimension_numbers = #tpu.dot_dimension_numbers<[1], [1], [0], [0], [0, 0, 1, 0], [], []>} : vector<64x32xbf16>, vector<64x32xbf16>, vector<64x64xf32> -> vector<64x64xf32>
    %cst_6 = arith.constant 0.176776692 : f32
    %8 = vector.broadcast %cst_6 : f32 to vector<64x64xf32>
    %9 = arith.mulf %7, %8 : vector<64x64xf32>
    %c64_i32 = arith.constant 64 : i32
    %10 = arith.muli %arg2, %c64_i32 : i32
    %11 = tpu.iota {dimensions = array<i32: 1>} : vector<64x64xi32>
    %12 = vector.broadcast %10 : i32 to vector<64x64xi32>
    %13 = arith.addi %12, %11 : vector<64x64xi32>
    %c64_i32_7 = arith.constant 64 : i32
    %14 = vector.broadcast %c64_i32_7 : i32 to vector<64x64xi32>
    %15 = arith.cmpi slt, %13, %14 : vector<64x64xi32>
    %cst_8 = arith.constant -1.000000e+30 : f32
    %16 = vector.broadcast %cst_8 : f32 to vector<64x64xf32>
    %17 = arith.select %15, %9, %16 : vector<64x64xi1>, vector<64x64xf32>
    %c0_9 = arith.constant 0 : index
    %c0_10 = arith.constant 0 : index
    %18 = vector.load %arg7[%c0_9, %c0_10] : memref<64x1xf32, #tpu.memory_space<vmem>>, vector<64x1xf32>
    %cst_11 = arith.constant dense<0xFF800000> : vector<64xf32>
    %19 = vector.multi_reduction <maximumf>, %17, %cst_11 [1] : vector<64x64xf32> to vector<64xf32>
    %20 = vector.shape_cast %19 : vector<64xf32> to vector<64x1xf32>
    %21 = arith.maximumf %18, %20 : vector<64x1xf32>
    %22 = arith.subf %18, %21 : vector<64x1xf32>
    %23 = math.exp %22 : vector<64x1xf32>
    %24 = vector.broadcast %21 : vector<64x1xf32> to vector<64x64xf32>
    %25 = arith.subf %17, %24 : vector<64x64xf32>
    %26 = math.exp %25 : vector<64x64xf32>
    %c0_12 = arith.constant 0 : index
    %c0_13 = arith.constant 0 : index
    %27 = vector.load %arg8[%c0_12, %c0_13] : memref<64x1xf32, #tpu.memory_space<vmem>>, vector<64x1xf32>
    %28 = arith.mulf %23, %27 : vector<64x1xf32>
    %cst_14 = arith.constant dense<0.000000e+00> : vector<64xf32>
    %29 = vector.multi_reduction <add>, %26, %cst_14 [1] : vector<64x64xf32> to vector<64xf32>
    %30 = vector.shape_cast %29 : vector<64xf32> to vector<64x1xf32>
    %31 = arith.addf %28, %30 : vector<64x1xf32>
    %c0_15 = arith.constant 0 : index
    %c0_16 = arith.constant 0 : index
    %32 = vector.load %arg8[%c0_15, %c0_16] : memref<64x1xf32, #tpu.memory_space<vmem>>, vector<64x1xf32>
    tpu.vector_store %arg8[%c0_15, %c0_16], %31 {strides = array<i32>} : memref<64x1xf32, #tpu.memory_space<vmem>>, vector<64x1xf32>,
    %c0_17 = arith.constant 0 : index
    %c0_18 = arith.constant 0 : index
    %33 = vector.load %arg9[%c0_17, %c0_18] : memref<64x128xf32, #tpu.memory_space<vmem>>, vector<64x128xf32>
    %34 = vector.broadcast %23 : vector<64x1xf32> to vector<64x128xf32>
    %35 = arith.mulf %34, %33 : vector<64x128xf32>
    %36 = arith.truncf %26 : vector<64x64xf32> to vector<64x64xbf16>
    %c0_19 = arith.constant 0 : index
    %c0_20 = arith.constant 0 : index
    %c0_21 = arith.constant 0 : index
    %37 = vector.load %arg5[%c0_19, %c0_20, %c0_21] : memref<1x64x128xbf16, #tpu.memory_space<vmem>>, vector<1x64x128xbf16>
    %38 = vector.shape_cast %37 : vector<1x64x128xbf16> to vector<64x128xbf16>
    %cst_22 = arith.constant dense<0.000000e+00> : vector<64x128xf32>
    %39 = tpu.matmul %36, %38, %cst_22 {dimension_numbers = #tpu.dot_dimension_numbers<[1], [0], [0], [1], [0, 0, 1, 1], [], []>} : vector<64x64xbf16>, vector<64x128xbf16>, vector<64x128xf32> -> vector<64x128xf32>
    %40 = arith.addf %35, %39 : vector<64x128xf32>
    %c0_23 = arith.constant 0 : index
    %c0_24 = arith.constant 0 : index
    %41 = vector.load %arg9[%c0_23, %c0_24] : memref<64x128xf32, #tpu.memory_space<vmem>>, vector<64x128xf32>
    tpu.vector_store %arg9[%c0_23, %c0_24], %40 {strides = array<i32>} : memref<64x128xf32, #tpu.memory_space<vmem>>, vector<64x128xf32>,
    %c0_25 = arith.constant 0 : index
    %c0_26 = arith.constant 0 : index
    %42 = vector.load %arg7[%c0_25, %c0_26] : memref<64x1xf32, #tpu.memory_space<vmem>>, vector<64x1xf32>
    tpu.vector_store %arg7[%c0_25, %c0_26], %21 {strides = array<i32>} : memref<64x1xf32, #tpu.memory_space<vmem>>, vector<64x1xf32>,
    %c0_i32_27 = arith.constant 0 : i32
    %43 = arith.cmpi eq, %arg2, %c0_i32_27 : i32
    %44 = arith.extui %43 : i1 to i32
    %c0_i32_28 = arith.constant 0 : i32
    %45 = arith.cmpi ne, %44, %c0_i32_28 : i32
    scf.if %45 {
      %c0_29 = arith.constant 0 : index
      %c0_30 = arith.constant 0 : index
      %46 = vector.load %arg8[%c0_29, %c0_30] : memref<64x1xf32, #tpu.memory_space<vmem>>, vector<64x1xf32>
      %47 = tpu.reciprocal %46 {approx = true} : vector<64x1xf32> -> vector<64x1xf32>
      %c0_31 = arith.constant 0 : index
      %c0_32 = arith.constant 0 : index
      %48 = vector.load %arg9[%c0_31, %c0_32] : memref<64x128xf32, #tpu.memory_space<vmem>>, vector<64x128xf32>
      %49 = vector.broadcast %47 : vector<64x1xf32> to vector<64x128xf32>
      %50 = arith.mulf %48, %49 : vector<64x128xf32>
      %c0_33 = arith.constant 0 : index
      %c0_34 = arith.constant 0 : index
      %c0_35 = arith.constant 0 : index
      %51 = vector.load %arg6[%c0_33, %c0_34, %c0_35] : memref<1x64x128xf32, #tpu.memory_space<vmem>>, vector<1x64x128xf32>
      %52 = vector.shape_cast %51 : vector<1x64x128xf32> to vector<64x128xf32>
      %53 = vector.shape_cast %50 : vector<64x128xf32> to vector<1x64x128xf32>
      tpu.vector_store %arg6[%c0_33, %c0_34, %c0_35], %53 {strides = array<i32>} : memref<1x64x128xf32, #tpu.memory_space<vmem>>, vector<1x64x128xf32>,
    } else {
    }
    return
  }
  func.func @transform_0(%arg0: i32, %arg1: i32, %arg2: i32) -> (i32, i32, i32) {
    %c0_i32 = arith.constant 0 : i32
    %c0_i32_0 = arith.constant 0 : i32
    return %arg0, %arg1, %c0_i32 : i32, i32, i32
  }
  func.func @transform_1(%arg0: i32, %arg1: i32, %arg2: i32) -> (i32, i32, i32) {
    %c0_i32 = arith.constant 0 : i32
    %c0_i32_0 = arith.constant 0 : i32
    return %arg0, %arg2, %c0_i32 : i32, i32, i32
  }
  func.func @transform_2(%arg0: i32, %arg1: i32, %arg2: i32) -> (i32, i32, i32) {
    %c0_i32 = arith.constant 0 : i32
    %c0_i32_0 = arith.constant 0 : i32
    return %arg0, %arg2, %c0_i32 : i32, i32, i32
  }
  func.func @transform_3(%arg0: i32, %arg1: i32, %arg2: i32) -> (i32, i32, i32) {
    %c0_i32 = arith.constant 0 : i32
    %c0_i32_0 = arith.constant 0 : i32
    return %arg0, %arg1, %c0_i32 : i32, i32, i32
  }
}

</mosaic_0001>

<bundles_post_ra>
// kernel: self_attn_propagation.1
= control target key start
LH: loop header
LB: loop body
LE: loop exit
PB: predicated region body
PF: predicated region fallthrough
CT: control target
= control target key end

     0   :  { %s1302_s12 = smov 0   ;;  %s1304_s13 = smov 0   ;;  %s1560_s0 = inlined_call_operand.vmem [shape: bf16[2,64,32], index: 0, kind: input, shape index: {}]   ;;  %s1561_s1 = inlined_call_operand.vmem [shape: bf16[2,64,32], index: 1, kind: input, shape index: {}]   ;;  %s1562_s2 = inlined_call_operand.vmem [shape: bf16[2,64,128], index: 2, kind: input, shape index: {}]   ;;  %s1563_s3 = inlined_call_operand.vmem [shape: f32[2,64,128], index: 3, kind: output, shape index: {}]  }
   0x1   :  { %s1306_s14 = smov 0  }
   0x2 LB: > { %s32_s15 = sadd.s32 1, %s1273_s13  ;;  %p1079_p0 = scmp.ge.s32.totalorder %s1277_s14, 1  ;;  %s1277_s14 = sphi %s1306_s14, %s13_s14   ;;  %s1273_s13 = sphi %s1304_s13, %s1565_s13   ;;  %s1269_s12 = sphi %s1302_s12, %s1564_s12  }
   0x3   : > { %p34_p1 = scmp.ge.s32.totalorder %s32_s15, 2  ;;  %p199_p2 = scmp.lt.s32.totalorder %s1277_s14, 3 }
   0x5   : > { %s1567_s15 = smov (%p34_p1, %s32_s15), 0  ;;  %p200_p3 = pnand %p1079_p0, %p199_p2 }
   0x6   : > { %p250_p4 = scmp.lt.s32.totalorder (!%p200_p3), %s1269_s12, 1  ;;  %vm375_vm0 = vcmask (!%p200_p3), 261120   ;;  %vm294_vm1 = vcmask (!%p200_p3), 7168   ;;  %v1279_v12 = vmov (!%p200_p3), -1e+30   ;;  %v474_v13 = vlaneseq (!%p200_p3) }
   0x7   : > { %203 = sbr.rel (%p200_p3) target bundleno = 874 (0x36a), region = 32  ;;  %297 = vst.msk [vmem:[#allocation2 + $0x10] sm:$0xff] (!%p200_p3), %vm294_vm1, %v1279_v12  ;;  %295 = vst.msk [vmem:[#allocation2] sm:$0xff] (!%p200_p3), %vm294_vm1, %v1279_v12  ;;  %vm495_vm3 = vcmask (!%p200_p3), 523264   ;;  %v1280_v47 = vmov (!%p200_p3), 0   ;;  %v1281_v48 = vmov (!%p200_p3), 0.0  }
   0x8   : > { %296 = vst.msk [vmem:[#allocation2 + $0x8] sm:$0xff] (!%p200_p3), %vm294_vm1, %v1279_v12  ;;  %298 = vst.msk [vmem:[#allocation2 + $0x18] sm:$0xff] (!%p200_p3), %vm294_vm1, %v1279_v12  ;;  %v475_v14 = vand.u32 (!%p200_p3), 127, %v474_v13  ;;  %1193 = vset.pattern.permute.xlu0 (!%p200_p3), %v1280_v47  ;;  %1194 = vset.pattern.permute.xlu1 (!%p200_p3), %v1280_v47 }
   0x9   : > { %299 = vst.msk [vmem:[#allocation2 + $0x20] sm:$0xff] (!%p200_p3), %vm294_vm1, %v1279_v12  ;;  %300 = vst.msk [vmem:[#allocation2 + $0x28] sm:$0xff] (!%p200_p3), %vm294_vm1, %v1279_v12 }
   0xa   : > { %301 = vst.msk [vmem:[#allocation2 + $0x30] sm:$0xff] (!%p200_p3), %vm294_vm1, %v1279_v12  ;;  %302 = vst.msk [vmem:[#allocation2 + $0x38] sm:$0xff] (!%p200_p3), %vm294_vm1, %v1279_v12  ;;  %vm478_vm2 = vcmp.lt.s32.totalorder (!%p200_p3), %v475_v14, 64 }
   0xb   : > { %305 = vst.msk [vmem:[#allocation3 + $0x10] sm:$0xff] (!%p200_p3), %vm294_vm1, %v1281_v48  ;;  %303 = vst.msk [vmem:[#allocation3] sm:$0xff] (!%p200_p3), %vm294_vm1, %v1281_v48 }
   0xc   : > { %304 = vst.msk [vmem:[#allocation3 + $0x8] sm:$0xff] (!%p200_p3), %vm294_vm1, %v1281_v48  ;;  %306 = vst.msk [vmem:[#allocation3 + $0x18] sm:$0xff] (!%p200_p3), %vm294_vm1, %v1281_v48 }
   0xd   : > { %307 = vst.msk [vmem:[#allocation3 + $0x20] sm:$0xff] (!%p200_p3), %vm294_vm1, %v1281_v48  ;;  %308 = vst.msk [vmem:[#allocation3 + $0x28] sm:$0xff] (!%p200_p3), %vm294_vm1, %v1281_v48 }
   0xe   : > { %s1569_s12 = smov (!%p250_p4, %s1269_s12), 1  ;;  %309 = vst.msk [vmem:[#allocation3 + $0x30] sm:$0xff] %vm294_vm1, %v1281_v48  ;;  %310 = vst.msk [vmem:[#allocation3 + $0x38] sm:$0xff] %vm294_vm1, %v1281_v48  ;;  %v1401_v49 = vld [vmem:[#allocation2 + $0x10] sm:$0xff]  ;;  %v1403_v50 = vld [vmem:[#allocation2] sm:$0xff] }
   0xf   : > { %s1323_s16 = sshll.u32 %s1569_s12, 5  ;;  %v1411_v55 = vld [vmem:[#allocation2 + $0x18] sm:$0xff]  ;;  %v1418_v57 = vld [vmem:[#allocation2 + $0x8] sm:$0xff]  ;;  %s1113_s26 = sshll.u32 %s1569_s12, 6 }
  0x10   : > { %s267_s19 = scalar_lea.vmem %s1561_s1, %s1323_s16  ;;  %s257_s22 = scalar_lea.vmem %s1560_s0, %s1323_s16 }
  0x11   : > { %v1195_v0 = vld [vmem:[%s267_s19] sm:$0xff]   ;;  %v1196_v1 = vld [vmem:[%s267_s19 + $0x8] sm:$0xff]   ;;  %v1197_v5 = vld [vmem:[%s267_s19 + $0x10] sm:$0xff]   ;;  %s277_s25 = scalar_lea.vmem %s1562_s2, %s1323_s16  ;;  %s1541_s29 = scalar_lea.vmem %s1563_s3, %s1113_s26 }
  0x12   : > { %1162 = vmatprep.subr.msk.bf16.mxu0 %vm375_vm0, %v1195_v0  ;;  %v389_v2 = vsel %vm375_vm0, %v1195_v0, 0  ;;  %v1199_v3 = vld [vmem:[%s257_s22] sm:$0xff]   ;;  %v392_v4 = vsel %vm375_vm0, %v1196_v1, 0  ;;  %v395_v6 = vsel %vm375_vm0, %v1197_v5, 0  ;;  %v1198_v7 = vld [vmem:[%s267_s19 + $0x18] sm:$0xff]   ;;  %v1200_v9 = vld [vmem:[%s257_s22 + $0x8] sm:$0xff]  }
  0x13   : > { %1131 = vmatpush3.bf16.xpose.msra.mxu0 %v389_v2  ;;  %1138 = vmatprep.mubr.msk.bf16.mxu0 %vm375_vm0, %v1199_v3  ;;  %v398_v8 = vsel %vm375_vm0, %v1198_v7, 0  ;;  %v1201_v10 = vld [vmem:[%s257_s22 + $0x10] sm:$0xff]   ;;  %v1202_v11 = vld [vmem:[%s257_s22 + $0x18] sm:$0xff]   ;;  %v1436_v0 = vld [vmem:[#allocation2 + $0x20] sm:$0xff] }
  0x14   : > { %1163 = vmatprep.subr.msk.bf16.mxu0 %vm375_vm0, %v1196_v1  ;;  %v1442_v3 = vld [vmem:[#allocation2 + $0x28] sm:$0xff] }
  0x1b   : > { %1133 = vmatpush3.bf16.xpose.msra.mxu0 %v392_v4 }
  0x1c   : > { %1164 = vmatprep.subr.msk.bf16.mxu0 %vm375_vm0, %v1197_v5  ;;  %v1447_v5 = vld [vmem:[#allocation2 + $0x30] sm:$0xff] }
  0x23   : > { %1135 = vmatpush3.bf16.xpose.msra.mxu0 %v395_v6 }
  0x24   : > { %1165 = vmatprep.subr.msk.bf16.mxu0 %vm375_vm0, %v1198_v7  ;;  %v1454_v7 = vld [vmem:[#allocation2 + $0x38] sm:$0xff] }
  0x2b   : > { %1137 = vmatpush3.bf16.xpose.msra.mxu0 %v398_v8  ;;  %v1203_v8 = vld [vmem:[%s277_s25] sm:$0xff]  }
  0x2c   : > { %1146 = vmatprep.subr.bf16.mxu1 %v1203_v8 }
  0x2d   : > { %1147 = vmatpush3.bf16.msra.mxu1 %v1203_v8 }
  0x32   : > { %1139 = vmatmul.mubr.msk.bf16.vlgmr.msra.gmra.mrb[0].mxu0 %vm375_vm0, %v1200_v9 }
  0x33   : > { %1142 = vmatprep.mubr.msk.bf16.mxu0 %vm375_vm0, %v1201_v10 }
  0x3a   : > { %1143 = vmatmul.mubr.msk.bf16.gmra.mrb[4].mxu0 %vm375_vm0, %v1202_v11 }
 0x105   : > { %v1140_v15 = vpop.f32.mrb[0].mxu0 }
 0x106   : > { %v467_v16 = vmul.f32 0.17677669, %v1140_v15  ;;  %v434_v17 = vpop.f32.mrb[1].mxu0  ;;  %v1204_v15 = vld [vmem:[%s277_s25 + $0x8] sm:$0xff]  }
 0x107   : > { %v465_v18 = vmul.f32 0.17677669, %v434_v17  ;;  %v1141_v19 = vpop.f32.mrb[2].mxu0  ;;  %1148 = vmatprep.subr.bf16.mxu1 %v1204_v15 }
 0x108   : > { %v468_v20 = vmul.f32 0.17677669, %v1141_v19  ;;  %v437_v21 = vpop.f32.mrb[3].mxu0  ;;  %v1354_v22 = vsel %vm478_vm2, %v467_v16, -1e+30  ;;  %1149 = vmatpush3.bf16.msra.mxu1 %v1204_v15  ;;  %v1205_v19 = vld [vmem:[%s277_s25 + $0x10] sm:$0xff]  }
 0x109   : > { %v466_v23 = vmul.f32 0.17677669, %v437_v21  ;;  %v502_v24 = vsel %vm495_vm3, %v1354_v22, -inf  ;;  %v1359_v25 = vsel %vm478_vm2, %v465_v18, -1e+30  ;;  %1150 = vmatprep.subr.bf16.mxu1 %v1205_v19 }
 0x10a   : > { %503 = vmax.xlane.f32.xlu1 %v502_v24  ;;  %v496_v26 = vsel %vm495_vm3, %v1359_v25, -inf  ;;  %v1364_v27 = vsel %vm478_vm2, %v468_v20, -1e+30  ;;  %v1206_v20 = vld [vmem:[%s277_s25 + $0x18] sm:$0xff]  }
 0x10b   : > { %497 = vmax.xlane.f32.xlu0 %v496_v26  ;;  %v1367_v28 = vsel %vm478_vm2, %v466_v23, -1e+30  ;;  %v505_v30 = vsel %vm495_vm3, %v1364_v27, -inf }
 0x10c   : > { %v499_v32 = vsel %vm495_vm3, %v1367_v28, -inf  ;;  %1151 = vmatpush3.bf16.msra.mxu1 %v1205_v19 }
 0x10d   : > { %v1144_v29 = vpop.f32.mrb[4].mxu0  ;;  %1152 = vmatprep.subr.bf16.mxu1 %v1206_v20 }
 0x10e   : > { %506 = vmax.xlane.f32.xlu1 %v505_v30  ;;  %v450_v31 = vpop.f32.mrb[5].mxu0  ;;  %v471_v33 = vmul.f32 0.17677669, %v1144_v29 }
 0x10f   : > { %v469_v34 = vmul.f32 0.17677669, %v450_v31  ;;  %500 = vmax.xlane.f32.xlu0 %v499_v32  ;;  %v1145_v35 = vpop.f32.mrb[6].mxu0 }
 0x110   : > { %v453_v36 = vpop.f32.mrb[7].mxu0  ;;  %v472_v37 = vmul.f32 0.17677669, %v1145_v35  ;;  %v1382_v42 = vsel %vm478_vm2, %v471_v33, -1e+30  ;;  %1153 = vmatpush3.bf16.msra.mxu1 %v1206_v20 }
 0x111   : > { %v470_v38 = vmul.f32 0.17677669, %v453_v36  ;;  %v1374_v39 = vsel %vm478_vm2, %v469_v34, -1e+30  ;;  %v514_v45 = vsel %vm495_vm3, %v1382_v42, -inf }
 0x112   : > { %v508_v40 = vsel %vm495_vm3, %v1374_v39, -inf  ;;  %v1387_v44 = vsel %vm478_vm2, %v472_v37, -1e+30 }
 0x113   : > { %509 = vmax.xlane.f32.xlu0 %v508_v40  ;;  %v1379_v41 = vsel %vm478_vm2, %v470_v38, -1e+30  ;;  %v517_v46 = vsel %vm495_vm3, %v1387_v44, -inf }
 0x114   : > { %v511_v43 = vsel %vm495_vm3, %v1379_v41, -inf }
 0x115   : > { %512 = vmax.xlane.f32.xlu1 %v511_v43 }
 0x117   : > { %515 = vmax.xlane.f32.xlu0 %v514_v45 }
 0x119   : > { %518 = vmax.xlane.f32.xlu1 %v517_v46 }
 0x197   : > { %v504_v51 = vpop.xlane.xlu1 %503 }
 0x198   : > { %v1406_v52 = vmax.f32 %v1401_v49, %v504_v51  ;;  %v498_v53 = vpop.xlane.xlu0 %497 }
 0x199   : > { %v1409_v54 = vmax.f32 %v1403_v50, %v498_v53 }
 0x19a   : > { %v530_v56 = vsub.f32 %v1401_v49, %v1406_v52  ;;  %860 = vst.msk [vmem:[#allocation2 + $0x10] sm:$0xff] %vm294_vm1, %v1406_v52  ;;  %564 = vperm.xlu1 %1194, %v1406_v52  }
 0x19b   : > { %v528_v58 = vsub.f32 %v1403_v50, %v1409_v54  ;;  %858 = vst.msk [vmem:[#allocation2] sm:$0xff] %vm294_vm1, %v1409_v54  ;;  %v507_v59 = vpop.xlane.xlu1 %506  ;;  %554 = vperm.xlu0 %1193, %v1409_v54  }
 0x19c   : > { %v1426_v60 = vmax.f32 %v1411_v55, %v507_v59  ;;  %v501_v61 = vpop.xlane.xlu0 %500 }
 0x19d   : > { %v1429_v62 = vmax.f32 %v1418_v57, %v501_v61 }
 0x19e   : > { %v531_v63 = vsub.f32 %v1411_v55, %v1426_v60  ;;  %861 = vst.msk [vmem:[#allocation2 + $0x18] sm:$0xff] %vm294_vm1, %v1426_v60  ;;  %569 = vperm.xlu1 %1194, %v1426_v60  }
 0x19f   : > { %v529_v1 = vsub.f32 %v1418_v57, %v1429_v62  ;;  %859 = vst.msk [vmem:[#allocation2 + $0x8] sm:$0xff] %vm294_vm1, %v1429_v62 }
 0x1a0   : > { %v510_v2 = vpop.xlane.xlu0 %509 }
 0x1a1   : > { %v1445_v4 = vmax.f32 %v1436_v0, %v510_v2 }
 0x1a2   : > { %559 = vperm.xlu1 %1194, %v1429_v62   ;;  %v513_v6 = vpop.xlane.xlu1 %512 }
 0x1a3   : > { %v532_v9 = vsub.f32 %v1436_v0, %v1445_v4  ;;  %862 = vst.msk [vmem:[#allocation2 + $0x20] sm:$0xff] %vm294_vm1, %v1445_v4  ;;  %v1461_v10 = vmax.f32 %v1442_v3, %v513_v6 }
 0x1a4   : > { %v516_v11 = vpop.xlane.xlu0 %515 }
 0x1a5   : > { %v533_v12 = vsub.f32 %v1442_v3, %v1461_v10  ;;  %863 = vst.msk [vmem:[#allocation2 + $0x28] sm:$0xff] %vm294_vm1, %v1461_v10  ;;  %v1468_v13 = vmax.f32 %v1447_v5, %v516_v11  ;;  %v544_v57 = vmul.f32 1.442695, %v532_v9  ;;  %v616_v3 = vld [vmem:[#allocation3] sm:$0xff] }
 0x1a6   : > { %v519_v14 = vpop.xlane.xlu1 %518 }
 0x1a7   : > { %v534_v16 = vsub.f32 %v1447_v5, %v1468_v13  ;;  %864 = vst.msk [vmem:[#allocation2 + $0x30] sm:$0xff] %vm294_vm1, %v1468_v13  ;;  %v1475_v17 = vmax.f32 %v1454_v7, %v519_v14  ;;  %584 = vperm.xlu1 %1194, %v1468_v13   ;;  %v546_v50 = vmul.f32 1.442695, %v533_v12  ;;  %v619_v12 = vld [vmem:[#allocation3 + $0x18] sm:$0xff] }
 0x1a9   : > { %v535_v18 = vsub.f32 %v1454_v7, %v1475_v17  ;;  %865 = vst.msk [vmem:[#allocation2 + $0x38] sm:$0xff] %vm294_vm1, %v1475_v17  ;;  %v548_v49 = vmul.f32 1.442695, %v534_v16 }
 0x1ab   : > { %574 = vperm.xlu1 %1194, %v1445_v4   ;;  %v550_v52 = vmul.f32 1.442695, %v535_v18 }
 0x1af   : > { %579 = vperm.xlu1 %1194, %v1461_v10  }
 0x1b3   : > { %589 = vperm.xlu1 %1194, %v1475_v17   ;;  %v617_v17 = vld [vmem:[#allocation3 + $0x8] sm:$0xff] }
 0x219   : > { %v565_v21 = vpop.permute.xlu1 %564 }
 0x21a   : > { %v594_v23 = vsub.f32 %v1354_v22, %v565_v21  ;;  %v555_v24 = vpop.permute.xlu0 %554 }
 0x21b   : > { %v592_v26 = vsub.f32 %v1359_v25, %v555_v24 }
 0x21c   : > { %v604_v29 = vmul.f32 1.442695, %v594_v23 }
 0x21d   : > { %v600_v30 = vmul.f32 1.442695, %v592_v26  ;;  %v570_v31 = vpop.permute.xlu1 %569 }
 0x21e   : > { %1207 = vpow2.f32 %v604_v29  ;;  %v595_v32 = vsub.f32 %v1364_v27, %v570_v31  ;;  %v538_v29 = vmul.f32 1.442695, %v529_v1  ;;  %v540_v31 = vmul.f32 1.442695, %v530_v56  ;;  %v618_v1 = vld [vmem:[#allocation3 + $0x10] sm:$0xff] }
 0x21f   : > { %1209 = vpow2.f32 %v600_v30  ;;  %v536_v30 = vmul.f32 1.442695, %v528_v58 }
 0x220   : > { %v606_v33 = vmul.f32 1.442695, %v595_v32  ;;  %v542_v32 = vmul.f32 1.442695, %v531_v63 }
 0x221   : > { %v560_v34 = vpop.permute.xlu1 %559 }
 0x222   : > { %1211 = vpow2.f32 %v606_v33  ;;  %v593_v35 = vsub.f32 %v1367_v28, %v560_v34 }
 0x224   : > { %v602_v36 = vmul.f32 1.442695, %v593_v35 }
 0x226   : > { %1213 = vpow2.f32 %v602_v36  ;;  %v585_v37 = vpop.permute.xlu1 %584 }
 0x227   : > { %v598_v40 = vsub.f32 %v1382_v42, %v585_v37 }
 0x228   : > { %v1208_v38 = vpop.eup %1207 }
 0x229   : > { %v1210_v22 = vpop.eup %1209  ;;  %v638_v25 = vsel %vm495_vm3, %v1208_v38, 0.0  ;;  %v612_v47 = vmul.f32 1.442695, %v598_v40 }
 0x22a   : > { %639 = vadd.xlane.f32.xlu0 %v638_v25  ;;  %v575_v43 = vpop.permute.xlu1 %574  ;;  %v632_v45 = vsel %vm495_vm3, %v1210_v22, 0.0 }
 0x22b   : > { %v596_v27 = vsub.f32 %v1374_v39, %v575_v43  ;;  %633 = vadd.xlane.f32.xlu1 %v632_v45  ;;  %v622_v45 = vld [vmem:[#allocation3 + $0x30] sm:$0xff] }
 0x22c   : > { %v1212_v46 = vpop.eup %1211 }
 0x22d   : > { %v608_v48 = vmul.f32 1.442695, %v596_v27  ;;  %v641_v28 = vsel %vm495_vm3, %v1212_v46, 0.0  ;;  %v730_v39 = vpack.c.bf16 %v1212_v46, %v1208_v38  ;;  %v621_v27 = vld [vmem:[#allocation3 + $0x28] sm:$0xff] }
 0x22e   : > { %v580_v51 = vpop.permute.xlu1 %579 }
 0x22f   : > { %1215 = vpow2.f32 %v608_v48  ;;  %v597_v53 = vsub.f32 %v1379_v41, %v580_v51  ;;  %642 = vadd.xlane.f32.xlu1 %v641_v28 }
 0x230   : > { %v1214_v42 = vpop.eup %1213  ;;  %1217 = vpow2.f32 %v612_v47 }
 0x231   : > { %v610_v59 = vmul.f32 1.442695, %v597_v53  ;;  %v635_v61 = vsel %vm495_vm3, %v1214_v42, 0.0  ;;  %v729_v2 = vpack.c.bf16 %v1214_v42, %v1210_v22  ;;  %v620_v22 = vld [vmem:[#allocation3 + $0x20] sm:$0xff] }
 0x232   : > { %636 = vadd.xlane.f32.xlu0 %v635_v61  ;;  %v590_v6 = vpop.permute.xlu1 %589 }
 0x233   : > { %1219 = vpow2.f32 %v610_v59  ;;  %v599_v8 = vsub.f32 %v1387_v44, %v590_v6  ;;  %1154 = vmatprep.mubr.msk.bf16.mxu1 %vm495_vm3, %v729_v2  ;;  %v623_v59 = vld [vmem:[#allocation3 + $0x38] sm:$0xff] }
 0x234   : > { %1155 = vmatmul.mubr.msk.bf16.vlgmr.msra.gmra.mrb[0].mxu1 %vm495_vm3, %v730_v39 }
 0x235   : > { %v614_v11 = vmul.f32 1.442695, %v599_v8 }
 0x237   : > { %1221 = vpow2.f32 %v614_v11 }
 0x238   : > { %1223 = vpow2.f32 %v538_v29 }
 0x239   : > { %v1216_v41 = vpop.eup %1215  ;;  %1225 = vpow2.f32 %v536_v30 }
 0x23a   : > { %v644_v14 = vsel %vm495_vm3, %v1216_v41, 0.0  ;;  %v1218_v15 = vpop.eup %1217  ;;  %1227 = vpow2.f32 %v540_v31 }
 0x23b   : > { %645 = vadd.xlane.f32.xlu0 %v644_v14  ;;  %v650_v20 = vsel %vm495_vm3, %v1218_v15, 0.0  ;;  %1229 = vpow2.f32 %v542_v32 }
 0x23c   : > { %1231 = vpow2.f32 %v544_v57 }
 0x23d   : > { %v1220_v19 = vpop.eup %1219  ;;  %1233 = vpow2.f32 %v546_v50 }
 0x23e   : > { %v647_v21 = vsel %vm495_vm3, %v1220_v19, 0.0  ;;  %v731_v23 = vpack.c.bf16 %v1220_v19, %v1216_v41  ;;  %1235 = vpow2.f32 %v548_v49 }
 0x23f   : > { %651 = vadd.xlane.f32.xlu0 %v650_v20  ;;  %648 = vadd.xlane.f32.xlu1 %v647_v21  ;;  %1237 = vpow2.f32 %v550_v52 }
 0x240   : > { %1158 = vmatprep.mubr.msk.bf16.mxu1 %vm495_vm3, %v731_v23 }
 0x241   : > { %v1222_v44 = vpop.eup %1221 }
 0x242   : > { %v653_v24 = vsel %vm495_vm3, %v1222_v44, 0.0  ;;  %v732_v26 = vpack.c.bf16 %v1222_v44, %v1218_v15  ;;  %v1224_v54 = vpop.eup %1223 }
 0x243   : > { %654 = vadd.xlane.f32.xlu1 %v653_v24  ;;  %v1226_v55 = vpop.eup %1225  ;;  %v625_v34 = vmul.f32 %v1224_v54, %v617_v17 }
 0x244   : > { %1159 = vmatmul.mubr.msk.bf16.gmra.mrb[4].mxu1 %vm495_vm3, %v732_v26  ;;  %v1228_v56 = vpop.eup %1227  ;;  %v624_v7 = vmul.f32 %v1226_v55, %v616_v3 }
 0x245   : > { %v1230_v58 = vpop.eup %1229  ;;  %v626_v4 = vmul.f32 %v1228_v56, %v618_v1 }
 0x246   : > { %v1232_v60 = vpop.eup %1231  ;;  %v627_v16 = vmul.f32 %v1230_v58, %v619_v12 }
 0x247   : > { %v1234_v62 = vpop.eup %1233  ;;  %v628_v25 = vmul.f32 %v1232_v60, %v620_v22 }
 0x248   : > { %v1236_v63 = vpop.eup %1235  ;;  %v629_v28 = vmul.f32 %v1234_v62, %v621_v27 }
 0x249   : > { %v1238_v0 = vpop.eup %1237  ;;  %v630_v48 = vmul.f32 %v1236_v63, %v622_v45 }
 0x24a   : > { %v631_v6 = vmul.f32 %v1238_v0, %v623_v59 }
 0x254   : > { %688 = vperm.xlu1 %1194, %v1224_v54  }
 0x255   : > { %683 = vperm.xlu0 %1193, %v1226_v55  }
 0x258   : > { %693 = vperm.xlu1 %1194, %v1228_v56  }
 0x259   : > { %698 = vperm.xlu0 %1193, %v1230_v58  }
 0x25c   : > { %703 = vperm.xlu1 %1194, %v1232_v60  }
 0x25d   : > { %708 = vperm.xlu0 %1193, %v1234_v62  }
 0x260   : > { %713 = vperm.xlu1 %1194, %v1236_v63  }
 0x261   : > { %718 = vperm.xlu0 %1193, %v1238_v0  }
 0x2b7   : > { %v640_v5 = vpop.xlane.xlu0 %639 }
 0x2b8   : > { %v658_v9 = vadd.f32 %v640_v5, %v626_v4  ;;  %v634_v10 = vpop.xlane.xlu1 %633 }
 0x2b9   : > { %v656_v13 = vadd.f32 %v634_v10, %v624_v7 }
 0x2ba   : > { %667 = vst.msk [vmem:[#allocation3 + $0x10] sm:$0xff] %vm294_vm1, %v658_v9 }
 0x2bb   : > { %665 = vst.msk [vmem:[#allocation3] sm:$0xff] %vm294_vm1, %v656_v13 }
 0x2bc   : > { %v643_v18 = vpop.xlane.xlu1 %642 }
 0x2bd   : > { %v659_v33 = vadd.f32 %v643_v18, %v627_v16 }
 0x2bf   : > { %668 = vst.msk [vmem:[#allocation3 + $0x18] sm:$0xff] %vm294_vm1, %v659_v33  ;;  %v637_v35 = vpop.xlane.xlu0 %636 }
 0x2c0   : > { %v657_v36 = vadd.f32 %v637_v35, %v625_v34 }
 0x2c1   : > { %v871_v37 = vld [vmem:[#allocation3 + $0x10] sm:$0xff] }
 0x2c2   : > { %666 = vst.msk [vmem:[#allocation3 + $0x8] sm:$0xff] %vm294_vm1, %v657_v36  ;;  %1239 = vrcp.f32 %v871_v37  ;;  %v869_v38 = vld [vmem:[#allocation3] sm:$0xff] }
 0x2c3   : > { %1241 = vrcp.f32 %v869_v38 }
 0x2c6   : > { %v872_v40 = vld [vmem:[#allocation3 + $0x18] sm:$0xff] }
 0x2c7   : > { %1243 = vrcp.f32 %v872_v40 }
 0x2c8   : > { %v646_v43 = vpop.xlane.xlu0 %645 }
 0x2c9   : > { %v660_v46 = vadd.f32 %v646_v43, %v628_v25  ;;  %v870_v47 = vld [vmem:[#allocation3 + $0x8] sm:$0xff] }
 0x2ca   : > { %1245 = vrcp.f32 %v870_v47 }
 0x2cb   : > { %669 = vst.msk [vmem:[#allocation3 + $0x20] sm:$0xff] %vm294_vm1, %v660_v46 }
 0x2cc   : > { %v1240_v51 = vpop.eup %1239  ;;  %v652_v53 = vpop.xlane.xlu0 %651 }
 0x2cd   : > { %v649_v42 = vpop.xlane.xlu1 %648  ;;  %v662_v61 = vadd.f32 %v652_v53, %v630_v48  ;;  %905 = vperm.xlu1 %1194, %v1240_v51   ;;  %v1242_v39 = vpop.eup %1241 }
 0x2ce   : > { %v661_v2 = vadd.f32 %v649_v42, %v629_v28 }
 0x2cf   : > { %671 = vst.msk [vmem:[#allocation3 + $0x30] sm:$0xff] %vm294_vm1, %v662_v61 }
 0x2d0   : > { %670 = vst.msk [vmem:[#allocation3 + $0x28] sm:$0xff] %vm294_vm1, %v661_v2 }
 0x2d1   : > { %v655_v8 = vpop.xlane.xlu1 %654  ;;  %v1244_v11 = vpop.eup %1243  ;;  %895 = vperm.xlu1 %1194, %v1242_v39  }
 0x2d2   : > { %v663_v41 = vadd.f32 %v655_v8, %v631_v6  ;;  %910 = vperm.xlu0 %1193, %v1244_v11   ;;  %v873_v14 = vld [vmem:[#allocation3 + $0x20] sm:$0xff] }
 0x2d3   : > { %1247 = vrcp.f32 %v873_v14 }
 0x2d4   : > { %672 = vst.msk [vmem:[#allocation3 + $0x38] sm:$0xff] %vm294_vm1, %v663_v41  ;;  %v1246_v15 = vpop.eup %1245  ;;  %v684_v55 = vpop.permute.xlu0 %683 }
 0x2d5   : > { %v689_v54 = vpop.permute.xlu1 %688  ;;  %v721_v4 = vmul.f32 0.0, %v684_v55 }
 0x2d6   : > { %900 = vperm.xlu0 %1193, %v1246_v15   ;;  %v875_v19 = vld [vmem:[#allocation3 + $0x30] sm:$0xff]  ;;  %v722_v18 = vmul.f32 0.0, %v689_v54 }
 0x2d7   : > { %v874_v20 = vld [vmem:[#allocation3 + $0x28] sm:$0xff]  ;;  %1249 = vrcp.f32 %v875_v19 }
 0x2d8   : > { %1251 = vrcp.f32 %v874_v20  ;;  %v699_v58 = vpop.permute.xlu0 %698 }
 0x2d9   : > { %v694_v56 = vpop.permute.xlu1 %693  ;;  %v724_v9 = vmul.f32 0.0, %v699_v58 }
 0x2da   : > { %v723_v0 = vmul.f32 0.0, %v694_v56 }
 0x2db   : > { %v876_v21 = vld [vmem:[#allocation3 + $0x38] sm:$0xff] }
 0x2dc   : > { %1253 = vrcp.f32 %v876_v21  ;;  %v709_v62 = vpop.permute.xlu0 %708 }
 0x2dd   : > { %v1248_v23 = vpop.eup %1247  ;;  %v704_v60 = vpop.permute.xlu1 %703  ;;  %v726_v43 = vmul.f32 0.0, %v709_v62 }
 0x2de   : > { %915 = vperm.xlu1 %1194, %v1248_v23   ;;  %v725_v37 = vmul.f32 0.0, %v704_v60 }
 0x2e0   : > { %v719_v5 = vpop.permute.xlu0 %718 }
 0x2e1   : > { %v1250_v44 = vpop.eup %1249  ;;  %v714_v63 = vpop.permute.xlu1 %713  ;;  %v728_v28 = vmul.f32 0.0, %v719_v5 }
 0x2e2   : > { %v1252_v24 = vpop.eup %1251  ;;  %925 = vperm.xlu1 %1194, %v1250_v44   ;;  %v727_v40 = vmul.f32 0.0, %v714_v63 }
 0x2e3   : > { %920 = vperm.xlu0 %1193, %v1252_v24  }
 0x2e6   : > { %v1254_v26 = vpop.eup %1253 }
 0x2e7   : > { %930 = vperm.xlu0 %1193, %v1254_v26  }
 0x307   : > { %v1156_v29 = vpop.f32.mrb[0].mxu1 }
 0x308   : > { %v811_v30 = vpop.f32.mrb[1].mxu1  ;;  %v844_v1 = vadd.f32 %v1156_v29, %v723_v0 }
 0x309   : > { %v1157_v31 = vpop.f32.mrb[2].mxu1  ;;  %v842_v10 = vadd.f32 %v811_v30, %v721_v4 }
 0x30a   : > { %v814_v32 = vpop.f32.mrb[3].mxu1  ;;  %v845_v12 = vadd.f32 %v1157_v31, %v724_v9 }
 0x30b   : > { %v843_v34 = vadd.f32 %v814_v32, %v722_v18 }
 0x317   : > { %v1160_v57 = vpop.f32.mrb[4].mxu1 }
 0x318   : > { %v827_v50 = vpop.f32.mrb[5].mxu1  ;;  %v848_v45 = vadd.f32 %v1160_v57, %v727_v40 }
 0x319   : > { %v1161_v49 = vpop.f32.mrb[6].mxu1  ;;  %v846_v38 = vadd.f32 %v827_v50, %v725_v37 }
 0x31a   : > { %v830_v52 = vpop.f32.mrb[7].mxu1  ;;  %v849_v53 = vadd.f32 %v1161_v49, %v728_v28 }
 0x31b   : > { %v847_v27 = vadd.f32 %v830_v52, %v726_v43 }
 0x34c   : > { %v906_v3 = vpop.permute.xlu1 %905 }
 0x34d   : > { %v935_v7 = vmul.f32 %v906_v3, %v844_v1 }
 0x34f   : > { %943 = vst [vmem:[%s1541_s29 + $0x10] sm:$0xff] %v935_v7 }
 0x350   : > { %v896_v13 = vpop.permute.xlu1 %895 }
 0x351   : > { %v933_v16 = vmul.f32 %v896_v13, %v842_v10  ;;  %v911_v17 = vpop.permute.xlu0 %910 }
 0x352   : > { %v936_v33 = vmul.f32 %v911_v17, %v845_v12 }
 0x353   : > { %941 = vst [vmem:[%s1541_s29] sm:$0xff] %v933_v16 }
 0x354   : > { %944 = vst [vmem:[%s1541_s29 + $0x18] sm:$0xff] %v936_v33 }
 0x355   : > { %v901_v35 = vpop.permute.xlu0 %900 }
 0x356   : > { %v934_v36 = vmul.f32 %v901_v35, %v843_v34 }
 0x358   : > { %942 = vst [vmem:[%s1541_s29 + $0x8] sm:$0xff] %v934_v36 }
 0x35d   : > { %v916_v22 = vpop.permute.xlu1 %915 }
 0x35e   : > { %v937_v25 = vmul.f32 %v916_v22, %v846_v38 }
 0x360   : > { %945 = vst [vmem:[%s1541_s29 + $0x20] sm:$0xff] %v937_v25 }
 0x361   : > { %v926_v46 = vpop.permute.xlu1 %925 }
 0x362   : > { %v921_v47 = vpop.permute.xlu0 %920  ;;  %v939_v48 = vmul.f32 %v926_v46, %v848_v45 }
 0x363   : > { %v938_v51 = vmul.f32 %v921_v47, %v847_v27 }
 0x364   : > { %947 = vst [vmem:[%s1541_s29 + $0x30] sm:$0xff] %v939_v48 }
 0x365   : > { %946 = vst [vmem:[%s1541_s29 + $0x28] sm:$0xff] %v938_v51 }
 0x366   : > { %v931_v42 = vpop.permute.xlu0 %930 }
 0x367   : > { %v940_v59 = vmul.f32 %v931_v42, %v849_v53 }
 0x369   : > { %948 = vst [vmem:[%s1541_s29 + $0x38] sm:$0xff] %v940_v59 }
 0x36a PF: > { %s13_s14 = sadd.s32 1, %s1277_s14   ;;  %s1564_s12 = smov %s1273_s13 }
 0x36b   : > { %p10_p5 = scmp.ge.s32.totalorder %s13_s14, 4   ;;  %s1565_s13 = smov %s1567_s15 }
 0x36d   :  { %12 = sbr.rel (!%p10_p5) target bundleno = 2 (0x2), region = 76 }

</bundles_post_ra>
